<compile_context>
chip_gen: v5e
topology: v5e:2x2
jax: 0.10.0
libtpu: 0.0.40
codegen_flags: <defaults>
</compile_context>

<pallas_src>
import functools

import jax
import jax.numpy as jnp
from jax.experimental import pallas as pl
from jax.experimental.pallas import tpu as pltpu

HIDDEN = 256


def _critic_kernel(x_ref, w_ref, misc_ref, out_ref, *, in_pad):
    """Twin 4-layer MLP. Weights bf16 (direct to MXU), f32 accumulation.

    x_ref    : (B, in_pad) bf16   — [states | actions] (zero-padded cols)
    w_ref    : (in_pad + 512, 512) bf16   — packed weight slab (see header)
    misc_ref : (5, 512) f32
      row 0: [b1 net1 | b1 net2]
      row 1: [b2 net1 | b2 net2]
      row 2: [b3 net1 | b3 net2]
      row 3: [w4 net1 | w4 net2]   (width-1 head weights, bf16-rounded)
      row 4: [b4 net1, b4 net2, 0, ...]
    out_ref  : (B, 2) f32   — col 0 = q1, col 1 = q2
    """
    x = x_ref[...]                                        # (B, in_pad) bf16

    # Fused layer 1 of both twin nets: one (B,in_pad)@(in_pad,512) MXU pass.
    h1 = (jnp.dot(x, w_ref[0:in_pad, :], preferred_element_type=jnp.float32)
          + misc_ref[0:1, :])
    h1 = jnp.maximum(h1, 0.0)                             # (B, 512) f32

    def tail(h, net):
        lo, hi = net * HIDDEN, (net + 1) * HIDDEN
        w2 = w_ref[in_pad:in_pad + HIDDEN, lo:hi]                  # (256,256) bf16
        w3 = w_ref[in_pad + HIDDEN:in_pad + 2 * HIDDEN, lo:hi]     # (256,256) bf16
        h = (jnp.dot(h.astype(jnp.bfloat16), w2,
                     preferred_element_type=jnp.float32)
             + misc_ref[1:2, lo:hi])
        h = jnp.maximum(h, 0.0)
        h = (jnp.dot(h.astype(jnp.bfloat16), w3,
                     preferred_element_type=jnp.float32)
             + misc_ref[2:3, lo:hi])
        h = jnp.maximum(h, 0.0)
        # Width-1 head as a lane reduction (XLU) rather than an N=1 MXU pass.
        return jnp.sum(h * misc_ref[3:4, lo:hi], axis=-1, keepdims=True)

    q1 = tail(h1[:, 0:HIDDEN], 0)
    q2 = tail(h1[:, HIDDEN:2 * HIDDEN], 1)
    out_ref[:, 0:1] = q1 + misc_ref[4:5, 0:1]
    out_ref[:, 1:2] = q2 + misc_ref[4:5, 1:2]


def init_linear(key, in_dim, out_dim):
    """PyTorch-style uniform(-1/sqrt(in), 1/sqrt(in)) init.

    Weight is returned already transposed to (in_dim, out_dim); bias (out_dim,).
    """
    kw, kb = jax.random.split(key)
    bound = 1.0 / jnp.sqrt(jnp.float32(in_dim))
    w = jax.random.uniform(kw, (in_dim, out_dim), jnp.float32, -bound, bound)
    b = jax.random.uniform(kb, (out_dim,), jnp.float32, -bound, bound)
    return w, b


def init_critic_params(key, in_dim, hidden=HIDDEN):
    keys = jax.random.split(key, 8)
    dims = [(in_dim, hidden), (hidden, hidden), (hidden, hidden), (hidden, 1)]
    params = []
    for net in range(2):            # net1 then net2, 4 layers each
        for li, (di, do) in enumerate(dims):
            w, b = init_linear(keys[net * 4 + li], di, do)
            params.append((w, b))
    return params                    # list of 8 (w, b) tuples


def pack_critic_params(params, state_dim, action_dim):
    """Pack the 8 (w, b) layers into one bf16 weight slab + one f32 misc array."""
    (w1a_, b1a), (w2a_, b2a), (w3a_, b3a), (w4a_, b4a) = params[:4]
    (w1b_, b1b), (w2b_, b2b), (w3b_, b3b), (w4b_, b4b) = params[4:]

    in_dim = state_dim + action_dim
    in_pad = -(-in_dim // 16) * 16            # round up to a bf16 sublane tile

    w1 = jnp.concatenate([w1a_, w1b_], axis=1)                # (in_dim, 512)
    w1 = jnp.pad(w1, ((0, in_pad - in_dim), (0, 0)))          # (in_pad, 512)
    w2 = jnp.concatenate([w2a_, w2b_], axis=1)                # (256, 512)
    w3 = jnp.concatenate([w3a_, w3b_], axis=1)                # (256, 512)
    w_all = jnp.concatenate([w1, w2, w3], axis=0).astype(jnp.bfloat16)

    misc = jnp.zeros((5, 2 * HIDDEN), jnp.float32)
    misc = misc.at[0].set(jnp.concatenate([b1a, b1b]))
    misc = misc.at[1].set(jnp.concatenate([b2a, b2b]))
    misc = misc.at[2].set(jnp.concatenate([b3a, b3b]))
    w4 = jnp.concatenate([w4a_.reshape(-1), w4b_.reshape(-1)])
    misc = misc.at[3].set(w4.astype(jnp.bfloat16).astype(jnp.float32))
    misc = misc.at[4, 0].set(b4a[0])
    misc = misc.at[4, 1].set(b4b[0])
    return w_all, misc, in_pad


def critic_forward(states, actions, packed):
    """packed: output of pack_critic_params. Returns (q1, q2), each (B, 1)."""
    w_all, misc, in_pad = packed
    B = states.shape[0]
    in_dim = states.shape[1] + actions.shape[1]

    # Concat + bf16 cast + pad to the sublane tile in the wrapper (8x16 copy).
    x = jnp.concatenate([states, actions], axis=-1).astype(jnp.bfloat16)
    if in_pad != in_dim:
        x = jnp.pad(x, ((0, 0), (0, in_pad - in_dim)))

    vmem = pl.BlockSpec(memory_space=pltpu.MemorySpace.VMEM)
    flops = 2 * B * (in_pad * 2 * HIDDEN + 2 * 2 * HIDDEN * HIDDEN + 2 * HIDDEN)
    bytes_accessed = (x.size * 2 + w_all.size * 2 + misc.size * 4 + B * 2 * 4)

    out = pl.pallas_call(
        functools.partial(_critic_kernel, in_pad=in_pad),
        out_shape=jax.ShapeDtypeStruct((B, 2), jnp.float32),
        in_specs=[vmem, vmem, vmem],
        out_specs=vmem,
        cost_estimate=pl.CostEstimate(flops=flops, transcendentals=0,
                                      bytes_accessed=bytes_accessed),
    )(x, w_all, misc)

    return out[:, 0:1], out[:, 1:2]


def critic_forward_ref(states, actions, params):
    """Pure-JAX reference mirroring the PyTorch forward with the kernel's
    numerics: bf16 weights, bf16 activations at the matmul, f32 accumulation,
    bf16-rounded head weights applied in f32."""
    x = jnp.concatenate([states, actions], axis=-1).astype(jnp.float32)

    def net(ps):
        h = x
        for i, (w, b) in enumerate(ps):
            wq = w.astype(jnp.bfloat16)
            if i < 3:
                h = jnp.dot(h.astype(jnp.bfloat16), wq,
                            preferred_element_type=jnp.float32) + b
                h = jnp.maximum(h, 0.0)
            else:
                h = h @ wq.astype(jnp.float32) + b
        return h

    return net(params[:4]), net(params[4:])


if __name__ == "__main__":
    key = jax.random.PRNGKey(0)
    k_params, k_s, k_a = jax.random.split(key, 3)

    batch = 8
    state_dim = 12
    action_dim = 4
    in_dim = state_dim + action_dim

    params = init_critic_params(k_params, in_dim)
    packed = pack_critic_params(params, state_dim, action_dim)

    states = jax.random.normal(k_s, (batch, state_dim), jnp.float32)
    actions = jax.random.normal(k_a, (batch, action_dim), jnp.float32)

    q1, q2 = critic_forward(states, actions, packed)
    q1 = jax.block_until_ready(q1)
    q2 = jax.block_until_ready(q2)

    r1, r2 = critic_forward_ref(states, actions, params)
    assert q1.shape == (batch, 1) and q2.shape == (batch, 1)
    assert jnp.allclose(q1, r1, atol=1e-3, rtol=1e-3)
    assert jnp.allclose(q2, r2, atol=1e-3, rtol=1e-3)

    print("KERNEL_OK")
</pallas_src>

<mosaic_0001>
module attributes {stable_mosaic.version = 11 : i64} {
  func.func @_critic_kernel(%arg0: memref<8x16xbf16, #tpu.memory_space<vmem>>, %arg1: memref<528x512xbf16, #tpu.memory_space<vmem>>, %arg2: memref<5x512xf32, #tpu.memory_space<vmem>>, %arg3: memref<8x2xf32, #tpu.memory_space<vmem>>) attributes {dimension_semantics = [], scalar_prefetch = 0 : i64, scratch_operands = 0 : i64, tpu.core_type = #tpu.core_type<tc>} {
    %c0 = arith.constant 0 : index
    %c0_0 = arith.constant 0 : index
    %0 = vector.load %arg0[%c0, %c0_0] : memref<8x16xbf16, #tpu.memory_space<vmem>>, vector<8x16xbf16>
    %c0_1 = arith.constant 0 : index
    %c0_2 = arith.constant 0 : index
    %1 = vector.load %arg1[%c0_1, %c0_2] : memref<528x512xbf16, #tpu.memory_space<vmem>>, vector<16x512xbf16>
    %cst = arith.constant dense<0.000000e+00> : vector<8x512xf32>
    %2 = tpu.matmul %0, %1, %cst {dimension_numbers = #tpu.dot_dimension_numbers<[1], [0], [0], [1], [0, 0, 1, 1], [], []>} : vector<8x16xbf16>, vector<16x512xbf16>, vector<8x512xf32> -> vector<8x512xf32>
    %c0_3 = arith.constant 0 : index
    %c0_4 = arith.constant 0 : index
    %3 = vector.load %arg2[%c0_3, %c0_4] : memref<5x512xf32, #tpu.memory_space<vmem>>, vector<1x512xf32>
    %4 = vector.broadcast %3 : vector<1x512xf32> to vector<8x512xf32>
    %5 = arith.addf %2, %4 : vector<8x512xf32>
    %cst_5 = arith.constant 0.000000e+00 : f32
    %6 = vector.broadcast %cst_5 : f32 to vector<8x512xf32>
    %7 = arith.maximumf %5, %6 : vector<8x512xf32>
    %8 = vector.extract_strided_slice %7 {offsets = [0, 0], sizes = [8, 256], strides = [1, 1]} : vector<8x512xf32> to vector<8x256xf32>
    %c16 = arith.constant 16 : index
    %c0_6 = arith.constant 0 : index
    %9 = vector.load %arg1[%c16, %c0_6] : memref<528x512xbf16, #tpu.memory_space<vmem>>, vector<256x256xbf16>
    %c272 = arith.constant 272 : index
    %c0_7 = arith.constant 0 : index
    %10 = vector.load %arg1[%c272, %c0_7] : memref<528x512xbf16, #tpu.memory_space<vmem>>, vector<256x256xbf16>
    %11 = arith.truncf %8 : vector<8x256xf32> to vector<8x256xbf16>
    %cst_8 = arith.constant dense<0.000000e+00> : vector<8x256xf32>
    %12 = tpu.matmul %11, %9, %cst_8 {dimension_numbers = #tpu.dot_dimension_numbers<[1], [0], [0], [1], [0, 0, 1, 1], [], []>} : vector<8x256xbf16>, vector<256x256xbf16>, vector<8x256xf32> -> vector<8x256xf32>
    %c1 = arith.constant 1 : index
    %c0_9 = arith.constant 0 : index
    %13 = vector.load %arg2[%c1, %c0_9] : memref<5x512xf32, #tpu.memory_space<vmem>>, vector<1x256xf32>
    %14 = vector.broadcast %13 : vector<1x256xf32> to vector<8x256xf32>
    %15 = arith.addf %12, %14 : vector<8x256xf32>
    %cst_10 = arith.constant 0.000000e+00 : f32
    %16 = vector.broadcast %cst_10 : f32 to vector<8x256xf32>
    %17 = arith.maximumf %15, %16 : vector<8x256xf32>
    %18 = arith.truncf %17 : vector<8x256xf32> to vector<8x256xbf16>
    %cst_11 = arith.constant dense<0.000000e+00> : vector<8x256xf32>
    %19 = tpu.matmul %18, %10, %cst_11 {dimension_numbers = #tpu.dot_dimension_numbers<[1], [0], [0], [1], [0, 0, 1, 1], [], []>} : vector<8x256xbf16>, vector<256x256xbf16>, vector<8x256xf32> -> vector<8x256xf32>
    %c2 = arith.constant 2 : index
    %c0_12 = arith.constant 0 : index
    %20 = vector.load %arg2[%c2, %c0_12] : memref<5x512xf32, #tpu.memory_space<vmem>>, vector<1x256xf32>
    %21 = vector.broadcast %20 : vector<1x256xf32> to vector<8x256xf32>
    %22 = arith.addf %19, %21 : vector<8x256xf32>
    %cst_13 = arith.constant 0.000000e+00 : f32
    %23 = vector.broadcast %cst_13 : f32 to vector<8x256xf32>
    %24 = arith.maximumf %22, %23 : vector<8x256xf32>
    %c3 = arith.constant 3 : index
    %c0_14 = arith.constant 0 : index
    %25 = vector.load %arg2[%c3, %c0_14] : memref<5x512xf32, #tpu.memory_space<vmem>>, vector<1x256xf32>
    %26 = vector.broadcast %25 : vector<1x256xf32> to vector<8x256xf32>
    %27 = arith.mulf %24, %26 : vector<8x256xf32>
    %cst_15 = arith.constant dense<0.000000e+00> : vector<8xf32>
    %28 = vector.multi_reduction <add>, %27, %cst_15 [1] : vector<8x256xf32> to vector<8xf32>
    %29 = vector.shape_cast %28 : vector<8xf32> to vector<8x1xf32>
    %30 = vector.extract_strided_slice %7 {offsets = [0, 256], sizes = [8, 256], strides = [1, 1]} : vector<8x512xf32> to vector<8x256xf32>
    %c16_16 = arith.constant 16 : index
    %c256 = arith.constant 256 : index
    %31 = vector.load %arg1[%c16_16, %c256] : memref<528x512xbf16, #tpu.memory_space<vmem>>, vector<256x256xbf16>
    %c272_17 = arith.constant 272 : index
    %c256_18 = arith.constant 256 : index
    %32 = vector.load %arg1[%c272_17, %c256_18] : memref<528x512xbf16, #tpu.memory_space<vmem>>, vector<256x256xbf16>
    %33 = arith.truncf %30 : vector<8x256xf32> to vector<8x256xbf16>
    %cst_19 = arith.constant dense<0.000000e+00> : vector<8x256xf32>
    %34 = tpu.matmul %33, %31, %cst_19 {dimension_numbers = #tpu.dot_dimension_numbers<[1], [0], [0], [1], [0, 0, 1, 1], [], []>} : vector<8x256xbf16>, vector<256x256xbf16>, vector<8x256xf32> -> vector<8x256xf32>
    %c1_20 = arith.constant 1 : index
    %c256_21 = arith.constant 256 : index
    %35 = vector.load %arg2[%c1_20, %c256_21] : memref<5x512xf32, #tpu.memory_space<vmem>>, vector<1x256xf32>
    %36 = vector.broadcast %35 : vector<1x256xf32> to vector<8x256xf32>
    %37 = arith.addf %34, %36 : vector<8x256xf32>
    %cst_22 = arith.constant 0.000000e+00 : f32
    %38 = vector.broadcast %cst_22 : f32 to vector<8x256xf32>
    %39 = arith.maximumf %37, %38 : vector<8x256xf32>
    %40 = arith.truncf %39 : vector<8x256xf32> to vector<8x256xbf16>
    %cst_23 = arith.constant dense<0.000000e+00> : vector<8x256xf32>
    %41 = tpu.matmul %40, %32, %cst_23 {dimension_numbers = #tpu.dot_dimension_numbers<[1], [0], [0], [1], [0, 0, 1, 1], [], []>} : vector<8x256xbf16>, vector<256x256xbf16>, vector<8x256xf32> -> vector<8x256xf32>
    %c2_24 = arith.constant 2 : index
    %c256_25 = arith.constant 256 : index
    %42 = vector.load %arg2[%c2_24, %c256_25] : memref<5x512xf32, #tpu.memory_space<vmem>>, vector<1x256xf32>
    %43 = vector.broadcast %42 : vector<1x256xf32> to vector<8x256xf32>
    %44 = arith.addf %41, %43 : vector<8x256xf32>
    %cst_26 = arith.constant 0.000000e+00 : f32
    %45 = vector.broadcast %cst_26 : f32 to vector<8x256xf32>
    %46 = arith.maximumf %44, %45 : vector<8x256xf32>
    %c3_27 = arith.constant 3 : index
    %c256_28 = arith.constant 256 : index
    %47 = vector.load %arg2[%c3_27, %c256_28] : memref<5x512xf32, #tpu.memory_space<vmem>>, vector<1x256xf32>
    %48 = vector.broadcast %47 : vector<1x256xf32> to vector<8x256xf32>
    %49 = arith.mulf %46, %48 : vector<8x256xf32>
    %cst_29 = arith.constant dense<0.000000e+00> : vector<8xf32>
    %50 = vector.multi_reduction <add>, %49, %cst_29 [1] : vector<8x256xf32> to vector<8xf32>
    %51 = vector.shape_cast %50 : vector<8xf32> to vector<8x1xf32>
    %c4 = arith.constant 4 : index
    %c0_30 = arith.constant 0 : index
    %52 = vector.load %arg2[%c4, %c0_30] : memref<5x512xf32, #tpu.memory_space<vmem>>, vector<1x1xf32>
    %53 = vector.broadcast %52 : vector<1x1xf32> to vector<8x1xf32>
    %54 = arith.addf %29, %53 : vector<8x1xf32>
    %c0_31 = arith.constant 0 : index
    %c0_32 = arith.constant 0 : index
    %55 = vector.load %arg3[%c0_31, %c0_32] : memref<8x2xf32, #tpu.memory_space<vmem>>, vector<8x1xf32>
    tpu.vector_store %arg3[%c0_31, %c0_32], %54 {strides = array<i32>} : memref<8x2xf32, #tpu.memory_space<vmem>>, vector<8x1xf32>,
    %c4_33 = arith.constant 4 : index
    %c1_34 = arith.constant 1 : index
    %56 = vector.load %arg2[%c4_33, %c1_34] : memref<5x512xf32, #tpu.memory_space<vmem>>, vector<1x1xf32>
    %57 = vector.broadcast %56 : vector<1x1xf32> to vector<8x1xf32>
    %58 = arith.addf %51, %57 : vector<8x1xf32>
    %c0_35 = arith.constant 0 : index
    %c1_36 = arith.constant 1 : index
    %59 = vector.load %arg3[%c0_35, %c1_36] : memref<8x2xf32, #tpu.memory_space<vmem>>, vector<8x1xf32>
    tpu.vector_store %arg3[%c0_35, %c1_36], %58 {strides = array<i32>} : memref<8x2xf32, #tpu.memory_space<vmem>>, vector<8x1xf32>,
    return
  }
}

</mosaic_0001>

<bundles_post_ra>
// kernel: tpu_custom_call.1
= control target key start
LH: loop header
LB: loop body
LE: loop exit
PB: predicated region body
PF: predicated region fallthrough
CT: control target
= control target key end

     0   :  { %8 = vsyncpa [#allocation3], 0  ;;  %s2012_s0 = inlined_call_operand.hbm [shape: bf16[8,16], index: 0, kind: input, shape index: {}]   ;;  %s2013_s1 = inlined_call_operand.hbm [shape: bf16[528,512], index: 1, kind: input, shape index: {}]   ;;  %s2014_s2 = inlined_call_operand.hbm [shape: f32[5,512], index: 2, kind: input, shape index: {}]   ;;  %s2015_s3 = inlined_call_operand.vmem [shape: f32[8,2], index: 3, kind: output, shape index: {}]  }
   0x1   :  { %9 = vsyncpa [#allocation5], 0  ;;  %s25_s14 = sshll.u32 %s2013_s1, 4  ;;  %s1956_s15 = smov [#allocation4]   ;;  %s26_s14 = int_to_ptr.hbm [resolvable:$true] %s25_s14 }
   0x2   :  { %s27_s16 = sshll.u32 %s1956_s15, 4  ;;  %s15_s19 = sshll.u32 %s2012_s0, 4  ;;  %s28_s16 = int_to_ptr.vmem [resolvable:$true] %s27_s16  ;;  %s16_s19 = int_to_ptr.hbm [resolvable:$true] %s15_s19 }
   0x3   :  { %s1957_s20 = smov 256   ;;  %s1958_s21 = smov 16  }
   0x4   :  { %33 = dma.hbm_to_vmem [thread:$0]  %s26_s14, 16896, %s28_s16, [#allocation5], %s1957_s20, %s1957_s20, %s1958_s21  }
   0x5   :  { %s1959_s22 = smov [#allocation2]   ;;  %s39_s26 = sshll.u32 %s2014_s2, 4  ;;  %s40_s26 = int_to_ptr.hbm [resolvable:$true] %s39_s26 }
   0x6   :  { %s17_s23 = sshll.u32 %s1959_s22, 4  ;;  %s1960_s1 = smov [#allocation6]   ;;  %s18_s23 = int_to_ptr.vmem [resolvable:$true] %s17_s23 }
   0x7   :  { %20 = dma.hbm_to_vmem [thread:$0]  %s16_s19, 64, %s18_s23, [#allocation3]  }
   0x8   :  { %s41_s27 = sshll.u32 %s1960_s1, 4  ;;  %s42_s27 = int_to_ptr.vmem [resolvable:$true] %s41_s27 }
   0x9   :  { %44 = dma.hbm_to_vmem [thread:$0]  %s40_s26, 512, %s42_s27, [#allocation5]  }
   0xa   :  { %1952 = dma.done.wait [#allocation3], 64  }
   0xb   :  { %1953 = vsyncadd [#allocation3], 4294967232 }
   0xc   :  { %1954 = dma.done.wait [#allocation5], 17408  }
   0xd   :  { %1955 = vsyncadd [#allocation5], 4294949888  ;;  %vm93_vm0 = vcmask 130048   ;;  %v1213_v0 = vld [vmem:[#allocation4] sm:$0xf]  ;;  %vm1199_vm1 = vcmask 7168  }
   0xe   :  { %v1745_v1 = vld [vmem:[#allocation4 + $0xc] sm:$0xf0]  ;;  %v1743_v2 = vld [vmem:[#allocation4 + $0x4] sm:$0xf]  ;;  %v1215_v4 = vld [vmem:[#allocation4 + $0x10] sm:$0xf0] }
   0xf   :  { %v1214_v3 = vor.u32 %v1745_v1, %v1213_v0  ;;  %v58_v5 = vld [vmem:[#allocation2] sm:$0xf]  ;;  %v1221_v6 = vld [vmem:[#allocation4 + $0x8] sm:$0xf]  ;;  %v1218_v7 = vor.u32 %v1743_v2, %v1215_v4  ;;  %v1746_v8 = vld [vmem:[#allocation4 + $0x14] sm:$0xf0] }
  0x10   :  { %v1744_v9 = vld [vmem:[#allocation4 + $0xc] sm:$0xf]  ;;  %v1223_v10 = vld [vmem:[#allocation4 + $0x18] sm:$0xf0]  ;;  %v1222_v11 = vor.u32 %v1746_v8, %v1221_v6  ;;  %v1289_v13 = vld [vmem:[#allocation4 + $0x100] sm:$0xf] }
  0x11   :  { %104 = vmatpush.bf16.msra.mxu0 %v1214_v3  ;;  %v1226_v12 = vor.u32 %v1744_v9, %v1223_v10  ;;  %v1762_v14 = vld [vmem:[#allocation4 + $0x10c] sm:$0xf0]  ;;  %v1353_v15 = vld [vmem:[#allocation4 + $0x200] sm:$0xf]  ;;  %117 = vmatpush.bf16.msra.mxu1 %v1218_v7  ;;  %v1761_v18 = vld [vmem:[#allocation4 + $0x104] sm:$0xf] }
  0x12   :  { %v1290_v16 = vor.u32 %v1762_v14, %v1289_v13  ;;  %v1778_v17 = vld [vmem:[#allocation4 + $0x20c] sm:$0xf0]  ;;  %v1291_v19 = vld [vmem:[#allocation4 + $0x110] sm:$0xf0]  ;;  %130 = vmatpush.bf16.msra.mxu2 %v1222_v11  ;;  %v1777_v22 = vld [vmem:[#allocation4 + $0x204] sm:$0xf] }
  0x13   :  { %143 = vmatpush.bf16.msra.mxu3 %v1226_v12  ;;  %v1354_v20 = vor.u32 %v1778_v17, %v1353_v15  ;;  %v1294_v21 = vor.u32 %v1761_v18, %v1291_v19  ;;  %v1355_v23 = vld [vmem:[#allocation4 + $0x210] sm:$0xf0]  ;;  %v1281_v24 = vld [vmem:[#allocation4 + $0xe0] sm:$0xf]  ;;  %v1760_v26 = vld [vmem:[#allocation4 + $0xec] sm:$0xf0] }
  0x14   :  { %1227 = vmatmul.msk.bf16.vlgmr.msra.gmra.mxu0 %vm93_vm0, %v58_v5  ;;  %v1358_v25 = vor.u32 %v1777_v22, %v1355_v23  ;;  %v1345_v27 = vld [vmem:[#allocation4 + $0x1e0] sm:$0xf]  ;;  %v1776_v28 = vld [vmem:[#allocation4 + $0x1ec] sm:$0xf0]  ;;  %1228 = vmatmul.msk.bf16.vlgmr.msra.gmra.mxu1 %vm93_vm0, %v58_v5  ;;  %v1282_v29 = vor.u32 %v1760_v26, %v1281_v24  ;;  %v1759_v30 = vld [vmem:[#allocation4 + $0xe4] sm:$0xf] }
  0x15   :  { %386 = vmatpush.bf16.msrb.mxu0 %v1290_v16  ;;  %v1283_v31 = vld [vmem:[#allocation4 + $0xf0] sm:$0xf0]  ;;  %v1775_v32 = vld [vmem:[#allocation4 + $0x1e4] sm:$0xf]  ;;  %399 = vmatpush.bf16.msrb.mxu1 %v1354_v20  ;;  %v1346_v33 = vor.u32 %v1776_v28, %v1345_v27  ;;  %v1273_v36 = vld [vmem:[#allocation4 + $0xc0] sm:$0xf] }
  0x16   :  { %412 = vmatpush.bf16.msrb.mxu2 %v1294_v21  ;;  %v1286_v34 = vor.u32 %v1759_v30, %v1283_v31  ;;  %v1347_v35 = vld [vmem:[#allocation4 + $0x1f0] sm:$0xf0]  ;;  %v1758_v37 = vld [vmem:[#allocation4 + $0xcc] sm:$0xf0]  ;;  %v1337_v39 = vld [vmem:[#allocation4 + $0x1c0] sm:$0xf]  ;;  %1230 = vmatmul.msk.bf16.vlgmr.msra.gmra.mxu3 %vm93_vm0, %v58_v5 }
  0x17   :  { %425 = vmatpush.bf16.msrb.mxu3 %v1358_v25  ;;  %v1350_v38 = vor.u32 %v1775_v32, %v1347_v35  ;;  %1229 = vmatmul.msk.bf16.vlgmr.msra.gmra.mxu2 %vm93_vm0, %v58_v5  ;;  %v1774_v40 = vld [vmem:[#allocation4 + $0x1cc] sm:$0xf0]  ;;  %v1757_v41 = vld [vmem:[#allocation4 + $0xc4] sm:$0xf]  ;;  %v1275_v42 = vld [vmem:[#allocation4 + $0xd0] sm:$0xf0]  ;;  %v1274_v45 = vor.u32 %v1758_v37, %v1273_v36 }
  0x18   :  { %v1773_v43 = vld [vmem:[#allocation4 + $0x1c4] sm:$0xf]  ;;  %v1339_v44 = vld [vmem:[#allocation4 + $0x1d0] sm:$0xf0]  ;;  %v1338_v46 = vor.u32 %v1774_v40, %v1337_v39  ;;  %v1278_v47 = vor.u32 %v1757_v41, %v1275_v42  ;;  %v1265_v48 = vld [vmem:[#allocation4 + $0xa0] sm:$0xf] }
  0x19   :  { %387 = vmatpush.bf16.msrb.mxu0 %v1282_v29  ;;  %400 = vmatpush.bf16.msrb.mxu1 %v1346_v33  ;;  %v1756_v49 = vld [vmem:[#allocation4 + $0xac] sm:$0xf0]  ;;  %v1329_v50 = vld [vmem:[#allocation4 + $0x1a0] sm:$0xf]  ;;  %v1342_v51 = vor.u32 %v1773_v43, %v1339_v44  ;;  %v1755_v53 = vld [vmem:[#allocation4 + $0xa4] sm:$0xf] }
  0x1a   :  { %413 = vmatpush.bf16.msrb.mxu2 %v1286_v34  ;;  %v1772_v52 = vld [vmem:[#allocation4 + $0x1ac] sm:$0xf0]  ;;  %v1267_v54 = vld [vmem:[#allocation4 + $0xb0] sm:$0xf0]  ;;  %v1771_v55 = vld [vmem:[#allocation4 + $0x1a4] sm:$0xf]  ;;  %v1266_v57 = vor.u32 %v1756_v49, %v1265_v48 }
  0x1b   :  { %426 = vmatpush.bf16.msrb.mxu3 %v1350_v38  ;;  %v1331_v56 = vld [vmem:[#allocation4 + $0x1b0] sm:$0xf0]  ;;  %v1330_v58 = vor.u32 %v1772_v52, %v1329_v50  ;;  %v1270_v59 = vor.u32 %v1755_v53, %v1267_v54  ;;  %v1257_v60 = vld [vmem:[#allocation4 + $0x80] sm:$0xf]  ;;  %v1754_v61 = vld [vmem:[#allocation4 + $0x8c] sm:$0xf0] }
  0x1c   :  { %v1321_v62 = vld [vmem:[#allocation4 + $0x180] sm:$0xf]  ;;  %v1334_v63 = vor.u32 %v1771_v55, %v1331_v56  ;;  %v1770_v0 = vld [vmem:[#allocation4 + $0x18c] sm:$0xf0]  ;;  %v1753_v1 = vld [vmem:[#allocation4 + $0x84] sm:$0xf]  ;;  %v1258_v5 = vor.u32 %v1754_v61, %v1257_v60 }
  0x1d   :  { %388 = vmatpush.bf16.msrb.mxu0 %v1274_v45  ;;  %401 = vmatpush.bf16.msrb.mxu1 %v1338_v46  ;;  %v1259_v2 = vld [vmem:[#allocation4 + $0x90] sm:$0xf0]  ;;  %v1769_v3 = vld [vmem:[#allocation4 + $0x184] sm:$0xf]  ;;  %v1322_v6 = vor.u32 %v1770_v0, %v1321_v62  ;;  %v1249_v8 = vld [vmem:[#allocation4 + $0x60] sm:$0xf] }
  0x1e   :  { %414 = vmatpush.bf16.msrb.mxu2 %v1278_v47  ;;  %v1323_v4 = vld [vmem:[#allocation4 + $0x190] sm:$0xf0]  ;;  %v1262_v7 = vor.u32 %v1753_v1, %v1259_v2  ;;  %v1752_v9 = vld [vmem:[#allocation4 + $0x6c] sm:$0xf0]  ;;  %v1313_v10 = vld [vmem:[#allocation4 + $0x160] sm:$0xf] }
  0x1f   :  { %427 = vmatpush.bf16.msrb.mxu3 %v1342_v51  ;;  %v1326_v11 = vor.u32 %v1769_v3, %v1323_v4  ;;  %v1768_v12 = vld [vmem:[#allocation4 + $0x16c] sm:$0xf0]  ;;  %v1751_v13 = vld [vmem:[#allocation4 + $0x64] sm:$0xf]  ;;  %v1251_v14 = vld [vmem:[#allocation4 + $0x70] sm:$0xf0]  ;;  %v1250_v17 = vor.u32 %v1752_v9, %v1249_v8 }
  0x20   :  { %v1767_v15 = vld [vmem:[#allocation4 + $0x164] sm:$0xf]  ;;  %v1315_v16 = vld [vmem:[#allocation4 + $0x170] sm:$0xf0]  ;;  %v1314_v18 = vor.u32 %v1768_v12, %v1313_v10  ;;  %v1254_v19 = vor.u32 %v1751_v13, %v1251_v14  ;;  %v1241_v21 = vld [vmem:[#allocation4 + $0x40] sm:$0xf] }
  0x21   :  { %389 = vmatpush.bf16.msrb.mxu0 %v1266_v57  ;;  %402 = vmatpush.bf16.msrb.mxu1 %v1330_v58  ;;  %v1318_v20 = vor.u32 %v1767_v15, %v1315_v16  ;;  %v1750_v22 = vld [vmem:[#allocation4 + $0x4c] sm:$0xf0]  ;;  %v1305_v23 = vld [vmem:[#allocation4 + $0x140] sm:$0xf]  ;;  %v1749_v26 = vld [vmem:[#allocation4 + $0x44] sm:$0xf] }
  0x22   :  { %415 = vmatpush.bf16.msrb.mxu2 %v1270_v59  ;;  %v1242_v24 = vor.u32 %v1750_v22, %v1241_v21  ;;  %v1766_v25 = vld [vmem:[#allocation4 + $0x14c] sm:$0xf0]  ;;  %v1243_v27 = vld [vmem:[#allocation4 + $0x50] sm:$0xf0]  ;;  %v1765_v30 = vld [vmem:[#allocation4 + $0x144] sm:$0xf] }
  0x23   :  { %428 = vmatpush.bf16.msrb.mxu3 %v1334_v63  ;;  %v1306_v28 = vor.u32 %v1766_v25, %v1305_v23  ;;  %v1246_v29 = vor.u32 %v1749_v26, %v1243_v27  ;;  %v1307_v31 = vld [vmem:[#allocation4 + $0x150] sm:$0xf0]  ;;  %v1233_v33 = vld [vmem:[#allocation4 + $0x20] sm:$0xf]  ;;  %v1748_v34 = vld [vmem:[#allocation4 + $0x2c] sm:$0xf0] }
  0x24   :  { %v1310_v32 = vor.u32 %v1765_v30, %v1307_v31  ;;  %v1297_v35 = vld [vmem:[#allocation4 + $0x120] sm:$0xf]  ;;  %v1234_v36 = vor.u32 %v1748_v34, %v1233_v33  ;;  %v1764_v37 = vld [vmem:[#allocation4 + $0x12c] sm:$0xf0]  ;;  %v1747_v38 = vld [vmem:[#allocation4 + $0x24] sm:$0xf] }
  0x25   :  { %390 = vmatpush.bf16.msrb.mxu0 %v1258_v5  ;;  %403 = vmatpush.bf16.msrb.mxu1 %v1322_v6  ;;  %v1235_v39 = vld [vmem:[#allocation4 + $0x30] sm:$0xf0]  ;;  %v1298_v40 = vor.u32 %v1764_v37, %v1297_v35  ;;  %v1763_v42 = vld [vmem:[#allocation4 + $0x124] sm:$0xf]  ;;  %v1417_v45 = vld [vmem:[#allocation4 + $0x300] sm:$0xf] }
  0x26   :  { %416 = vmatpush.bf16.msrb.mxu2 %v1262_v7  ;;  %v1238_v41 = vor.u32 %v1747_v38, %v1235_v39  ;;  %v1299_v43 = vld [vmem:[#allocation4 + $0x130] sm:$0xf0]  ;;  %v1794_v46 = vld [vmem:[#allocation4 + $0x30c] sm:$0xf0]  ;;  %v1793_v47 = vld [vmem:[#allocation4 + $0x304] sm:$0xf] }
  0x27   :  { %429 = vmatpush.bf16.msrb.mxu3 %v1326_v11  ;;  %v1302_v44 = vor.u32 %v1763_v42, %v1299_v43  ;;  %v1418_v48 = vor.u32 %v1794_v46, %v1417_v45  ;;  %v1419_v49 = vld [vmem:[#allocation4 + $0x310] sm:$0xf0]  ;;  %v1409_v50 = vld [vmem:[#allocation4 + $0x2e0] sm:$0xf]  ;;  %v1792_v51 = vld [vmem:[#allocation4 + $0x2ec] sm:$0xf0] }
  0x28   :  { %v1422_v52 = vor.u32 %v1793_v47, %v1419_v49  ;;  %v1791_v53 = vld [vmem:[#allocation4 + $0x2e4] sm:$0xf]  ;;  %v1411_v54 = vld [vmem:[#allocation4 + $0x2f0] sm:$0xf0]  ;;  %v1481_v55 = vld [vmem:[#allocation4 + $0x400] sm:$0xf]  ;;  %v1410_v56 = vor.u32 %v1792_v51, %v1409_v50 }
  0x29   :  { %391 = vmatpush.bf16.msrb.mxu0 %v1250_v17  ;;  %404 = vmatpush.bf16.msrb.mxu1 %v1314_v18  ;;  %v1810_v57 = vld [vmem:[#allocation4 + $0x40c] sm:$0xf0]  ;;  %v1809_v58 = vld [vmem:[#allocation4 + $0x404] sm:$0xf]  ;;  %v1483_v59 = vld [vmem:[#allocation4 + $0x410] sm:$0xf0]  ;;  %v1414_v60 = vor.u32 %v1791_v53, %v1411_v54 }
  0x2a   :  { %417 = vmatpush.bf16.msrb.mxu2 %v1254_v19  ;;  %v1482_v61 = vor.u32 %v1810_v57, %v1481_v55  ;;  %v1486_v62 = vor.u32 %v1809_v58, %v1483_v59  ;;  %v1401_v63 = vld [vmem:[#allocation4 + $0x2c0] sm:$0xf]  ;;  %v1790_v0 = vld [vmem:[#allocation4 + $0x2cc] sm:$0xf0]  ;;  %v1789_v1 = vld [vmem:[#allocation4 + $0x2c4] sm:$0xf] }
  0x2b   :  { %430 = vmatpush.bf16.msrb.mxu3 %v1318_v20  ;;  %v1403_v2 = vld [vmem:[#allocation4 + $0x2d0] sm:$0xf0]  ;;  %v1473_v3 = vld [vmem:[#allocation4 + $0x3e0] sm:$0xf]  ;;  %v1808_v4 = vld [vmem:[#allocation4 + $0x3ec] sm:$0xf0]  ;;  %v1402_v8 = vor.u32 %v1790_v0, %v1401_v63 }
  0x2c   :  { %v1474_v5 = vor.u32 %v1808_v4, %v1473_v3  ;;  %v1807_v6 = vld [vmem:[#allocation4 + $0x3e4] sm:$0xf]  ;;  %v1475_v7 = vld [vmem:[#allocation4 + $0x3f0] sm:$0xf0]  ;;  %v1393_v10 = vld [vmem:[#allocation4 + $0x2a0] sm:$0xf]  ;;  %v1406_v12 = vor.u32 %v1789_v1, %v1403_v2 }
  0x2d   :  { %392 = vmatpush.bf16.msrb.mxu0 %v1242_v24  ;;  %405 = vmatpush.bf16.msrb.mxu1 %v1306_v28  ;;  %v1478_v9 = vor.u32 %v1807_v6, %v1475_v7  ;;  %v1788_v11 = vld [vmem:[#allocation4 + $0x2ac] sm:$0xf0]  ;;  %v1465_v13 = vld [vmem:[#allocation4 + $0x3c0] sm:$0xf]  ;;  %v1805_v15 = vld [vmem:[#allocation4 + $0x3c4] sm:$0xf] }
  0x2e   :  { %418 = vmatpush.bf16.msrb.mxu2 %v1246_v29  ;;  %v1806_v14 = vld [vmem:[#allocation4 + $0x3cc] sm:$0xf0]  ;;  %v1787_v16 = vld [vmem:[#allocation4 + $0x2a4] sm:$0xf]  ;;  %v1395_v17 = vld [vmem:[#allocation4 + $0x2b0] sm:$0xf0]  ;;  %v1394_v21 = vor.u32 %v1788_v11, %v1393_v10 }
  0x2f   :  { %431 = vmatpush.bf16.msrb.mxu3 %v1310_v32  ;;  %v1467_v18 = vld [vmem:[#allocation4 + $0x3d0] sm:$0xf0]  ;;  %v1466_v19 = vor.u32 %v1806_v14, %v1465_v13  ;;  %v1457_v22 = vld [vmem:[#allocation4 + $0x3a0] sm:$0xf]  ;;  %v1804_v23 = vld [vmem:[#allocation4 + $0x3ac] sm:$0xf0]  ;;  %v1398_v25 = vor.u32 %v1787_v16, %v1395_v17 }
  0x30   :  { %v1470_v20 = vor.u32 %v1805_v15, %v1467_v18  ;;  %v1803_v24 = vld [vmem:[#allocation4 + $0x3a4] sm:$0xf]  ;;  %v1385_v26 = vld [vmem:[#allocation4 + $0x280] sm:$0xf]  ;;  %v1786_v27 = vld [vmem:[#allocation4 + $0x28c] sm:$0xf0]  ;;  %v1458_v31 = vor.u32 %v1804_v23, %v1457_v22 }
  0x31   :  { %393 = vmatpush.bf16.msrb.mxu0 %v1234_v36  ;;  %406 = vmatpush.bf16.msrb.mxu1 %v1298_v40  ;;  %v1459_v28 = vld [vmem:[#allocation4 + $0x3b0] sm:$0xf0]  ;;  %v1785_v29 = vld [vmem:[#allocation4 + $0x284] sm:$0xf]  ;;  %v1449_v33 = vld [vmem:[#allocation4 + $0x380] sm:$0xf]  ;;  %v1386_v35 = vor.u32 %v1786_v27, %v1385_v26 }
  0x32   :  { %419 = vmatpush.bf16.msrb.mxu2 %v1238_v41  ;;  %v1387_v30 = vld [vmem:[#allocation4 + $0x290] sm:$0xf0]  ;;  %v1462_v32 = vor.u32 %v1803_v24, %v1459_v28  ;;  %v1994_v34 = vld [vmem:[#allocation6] ss:$8 sm:$0xf]  ;;  %vm1203_vm2 = vcmask 15368  }
  0x33   :  { %432 = vmatpush.bf16.msrb.mxu3 %v1302_v44  ;;  %v1802_v36 = vld [vmem:[#allocation4 + $0x38c] sm:$0xf0]  ;;  %v1801_v37 = vld [vmem:[#allocation4 + $0x384] sm:$0xf]  ;;  %v1451_v38 = vld [vmem:[#allocation4 + $0x390] sm:$0xf0]  ;;  %v1390_v39 = vor.u32 %v1785_v29, %v1387_v30 }
  0x34   :  { %v1377_v40 = vld [vmem:[#allocation4 + $0x260] sm:$0xf]  ;;  %v1784_v41 = vld [vmem:[#allocation4 + $0x26c] sm:$0xf0]  ;;  %v1783_v42 = vld [vmem:[#allocation4 + $0x264] sm:$0xf]  ;;  %v1450_v44 = vor.u32 %v1802_v36, %v1449_v33  ;;  %v1454_v45 = vor.u32 %v1801_v37, %v1451_v38 }
  0x35   :  { %609 = vmatpush.bf16.msra.mxu0 %v1418_v48  ;;  %622 = vmatpush.bf16.msra.mxu1 %v1482_v61  ;;  %v1379_v43 = vld [vmem:[#allocation4 + $0x270] sm:$0xf0]  ;;  %v1441_v46 = vld [vmem:[#allocation4 + $0x360] sm:$0xf]  ;;  %v1378_v47 = vor.u32 %v1784_v41, %v1377_v40  ;;  %v1800_v48 = vld [vmem:[#allocation4 + $0x36c] sm:$0xf0] }
  0x36   :  { %635 = vmatpush.bf16.msra.mxu2 %v1422_v52  ;;  %v1799_v49 = vld [vmem:[#allocation4 + $0x364] sm:$0xf]  ;;  %v1443_v50 = vld [vmem:[#allocation4 + $0x370] sm:$0xf0]  ;;  %v65_v51 = vperm.slane %v1994_v34, 0  ;;  %v1382_v52 = vor.u32 %v1783_v42, %v1379_v43  ;;  %v66_v55 = vperm.slane %v1994_v34, 1  ;;  %v1442_v58 = vor.u32 %v1800_v48, %v1441_v46 }
  0x37   :  { %648 = vmatpush.bf16.msra.mxu3 %v1486_v62  ;;  %v1369_v53 = vld [vmem:[#allocation4 + $0x240] sm:$0xf]  ;;  %v1782_v54 = vld [vmem:[#allocation4 + $0x24c] sm:$0xf0]  ;;  %v1371_v57 = vld [vmem:[#allocation4 + $0x250] sm:$0xf0]  ;;  %v1446_v59 = vor.u32 %v1799_v49, %v1443_v50 }
  0x38   :  { %v1370_v61 = vor.u32 %v1782_v54, %v1369_v53  ;;  %v1361_v62 = vld [vmem:[#allocation4 + $0x220] sm:$0xf]  ;;  %v1780_v63 = vld [vmem:[#allocation4 + $0x22c] sm:$0xf0]  ;;  %v1779_v3 = vld [vmem:[#allocation4 + $0x224] sm:$0xf] }
  0x39   :  { %610 = vmatpush.bf16.msra.mxu0 %v1410_v56  ;;  %623 = vmatpush.bf16.msra.mxu1 %v1474_v5  ;;  %v1781_v56 = vld [vmem:[#allocation4 + $0x244] sm:$0xf]  ;;  %v1363_v4 = vld [vmem:[#allocation4 + $0x230] sm:$0xf0]  ;;  %v1545_v5 = vld [vmem:[#allocation4 + $0x108] sm:$0xf]  ;;  %v1362_v17 = vor.u32 %v1780_v63, %v1361_v62 }
  0x3a   :  { %636 = vmatpush.bf16.msra.mxu2 %v1414_v60  ;;  %v1374_v2 = vor.u32 %v1781_v56, %v1371_v57  ;;  %v1826_v7 = vld [vmem:[#allocation4 + $0x114] sm:$0xf0]  ;;  %v1433_v11 = vld [vmem:[#allocation4 + $0x340] sm:$0xf]  ;;  %v1797_v14 = vld [vmem:[#allocation4 + $0x344] sm:$0xf]  ;;  %v1366_v18 = vor.u32 %v1779_v3, %v1363_v4 }
  0x3b   :  { %649 = vmatpush.bf16.msra.mxu3 %v1478_v9  ;;  %v1547_v9 = vld [vmem:[#allocation4 + $0x118] sm:$0xf0]  ;;  %v1435_v15 = vld [vmem:[#allocation4 + $0x350] sm:$0xf0]  ;;  %v1537_v22 = vld [vmem:[#allocation4 + $0xe8] sm:$0xf] }
  0x3c   :  { %v1824_v23 = vld [vmem:[#allocation4 + $0xf4] sm:$0xf0]  ;;  %v1823_v26 = vld [vmem:[#allocation4 + $0xec] sm:$0xf]  ;;  %v1539_v27 = vld [vmem:[#allocation4 + $0xf8] sm:$0xf0] }
  0x3d   :  { %611 = vmatpush.bf16.msra.mxu0 %v1402_v8  ;;  %624 = vmatpush.bf16.msra.mxu1 %v1466_v19  ;;  %v1825_v8 = vld [vmem:[#allocation4 + $0x10c] sm:$0xf]  ;;  %v1425_v28 = vld [vmem:[#allocation4 + $0x320] sm:$0xf]  ;;  %v1796_v30 = vld [vmem:[#allocation4 + $0x32c] sm:$0xf0]  ;;  %v1538_v37 = vor.u32 %v1824_v23, %v1537_v22  ;;  %v1542_v38 = vor.u32 %v1823_v26, %v1539_v27 }
  0x3e   :  { %637 = vmatpush.bf16.msra.mxu2 %v1406_v12  ;;  %v1798_v12 = vld [vmem:[#allocation4 + $0x34c] sm:$0xf0]  ;;  %v1609_v43 = vld [vmem:[#allocation4 + $0x208] sm:$0xf]  ;;  %v1822_v50 = vld [vmem:[#allocation4 + $0xd4] sm:$0xf0] }
  0x3f   :  { %650 = vmatpush.bf16.msra.mxu3 %v1470_v20  ;;  %v1546_v20 = vor.u32 %v1826_v7, %v1545_v5  ;;  %v1434_v24 = vor.u32 %v1798_v12, %v1433_v11  ;;  %v1529_v49 = vld [vmem:[#allocation4 + $0xc8] sm:$0xf]  ;;  %v1531_v53 = vld [vmem:[#allocation4 + $0xd8] sm:$0xf0]  ;;  %v1840_v56 = vld [vmem:[#allocation4 + $0x1f4] sm:$0xf0] }
  0x40   :  { %v1839_v57 = vld [vmem:[#allocation4 + $0x1ec] sm:$0xf]  ;;  %v1820_v62 = vld [vmem:[#allocation4 + $0xb4] sm:$0xf0]  ;;  %v1593_v3 = vld [vmem:[#allocation4 + $0x1c8] sm:$0xf] }
  0x41   :  { %612 = vmatpush.bf16.msra.mxu0 %v1394_v21  ;;  %625 = vmatpush.bf16.msra.mxu1 %v1458_v31  ;;  %v1550_v21 = vor.u32 %v1825_v8, %v1547_v9  ;;  %v1795_v31 = vld [vmem:[#allocation4 + $0x324] sm:$0xf]  ;;  %v1819_v63 = vld [vmem:[#allocation4 + $0xac] sm:$0xf]  ;;  %v1838_v4 = vld [vmem:[#allocation4 + $0x1d4] sm:$0xf0] }
  0x42   :  { %638 = vmatpush.bf16.msra.mxu2 %v1398_v25  ;;  %v1438_v25 = vor.u32 %v1797_v14, %v1435_v15  ;;  %v1594_v5 = vor.u32 %v1838_v4, %v1593_v3  ;;  %v1595_v7 = vld [vmem:[#allocation4 + $0x1d8] sm:$0xf0]  ;;  %v1513_v9 = vld [vmem:[#allocation4 + $0x88] sm:$0xf]  ;;  %v1817_v11 = vld [vmem:[#allocation4 + $0x8c] sm:$0xf] }
  0x43   :  { %651 = vmatpush.bf16.msra.mxu3 %v1462_v32  ;;  %v1427_v32 = vld [vmem:[#allocation4 + $0x330] sm:$0xf0]  ;;  %v1585_v15 = vld [vmem:[#allocation4 + $0x1a8] sm:$0xf]  ;;  %v1816_v22 = vld [vmem:[#allocation4 + $0x74] sm:$0xf0] }
  0x44   :  { %v1430_v40 = vor.u32 %v1795_v31, %v1427_v32  ;;  %v1815_v23 = vld [vmem:[#allocation4 + $0x6c] sm:$0xf]  ;;  %v1577_v27 = vld [vmem:[#allocation4 + $0x188] sm:$0xf]  ;;  %v1579_v31 = vld [vmem:[#allocation4 + $0x198] sm:$0xf0] }
  0x45   :  { %613 = vmatpush.bf16.msra.mxu0 %v1386_v35  ;;  %626 = vmatpush.bf16.msra.mxu1 %v1450_v44  ;;  %v1842_v44 = vld [vmem:[#allocation4 + $0x214] sm:$0xf0]  ;;  %v1497_v32 = vld [vmem:[#allocation4 + $0x48] sm:$0xf] }
  0x46   :  { %639 = vmatpush.bf16.msra.mxu2 %v1390_v39  ;;  %v1426_v39 = vor.u32 %v1796_v30, %v1425_v28  ;;  %v1610_v46 = vor.u32 %v1842_v44, %v1609_v43  ;;  %v1834_v28 = vld [vmem:[#allocation4 + $0x194] sm:$0xf0]  ;;  %v1831_v44 = vld [vmem:[#allocation4 + $0x16c] sm:$0xf] }
  0x47   :  { %652 = vmatpush.bf16.msra.mxu3 %v1454_v45  ;;  %v1841_v45 = vld [vmem:[#allocation4 + $0x20c] sm:$0xf]  ;;  %v1578_v30 = vor.u32 %v1834_v28, %v1577_v27  ;;  %v1832_v43 = vld [vmem:[#allocation4 + $0x174] sm:$0xf0] }
  0x49   :  { %614 = vmatpush.bf16.msra.mxu0 %v1378_v47  ;;  %627 = vmatpush.bf16.msra.mxu1 %v1442_v58  ;;  %v1611_v47 = vld [vmem:[#allocation4 + $0x218] sm:$0xf0] }
  0x4a   :  { %640 = vmatpush.bf16.msra.mxu2 %v1382_v52  ;;  %v1614_v48 = vor.u32 %v1841_v45, %v1611_v47  ;;  %v1530_v52 = vor.u32 %v1822_v50, %v1529_v49  ;;  %v1571_v45 = vld [vmem:[#allocation4 + $0x178] sm:$0xf0]  ;;  %v1812_v49 = vld [vmem:[#allocation4 + $0x34] sm:$0xf0]  ;;  %v1811_v50 = vld [vmem:[#allocation4 + $0x2c] sm:$0xf] }
  0x4b   :  { %653 = vmatpush.bf16.msra.mxu3 %v1446_v59  ;;  %v1603_v59 = vld [vmem:[#allocation4 + $0x1f8] sm:$0xf0]  ;;  %v1574_v47 = vor.u32 %v1831_v44, %v1571_v45 }
  0x4d   :  { %615 = vmatpush.bf16.msra.mxu0 %v1370_v61  ;;  %628 = vmatpush.bf16.msra.mxu1 %v1434_v24  ;;  %v1521_v61 = vld [vmem:[#allocation4 + $0xa8] sm:$0xf] }
  0x4e   :  { %641 = vmatpush.bf16.msra.mxu2 %v1374_v2 }
  0x4f   :  { %654 = vmatpush.bf16.msra.mxu3 %v1438_v25  ;;  %v1507_v25 = vld [vmem:[#allocation4 + $0x78] sm:$0xf0] }
  0x50   :  { %v1510_v26 = vor.u32 %v1815_v23, %v1507_v25  ;;  %v67_v23 = vperm.slane %v1994_v34, 2 }
  0x51   :  { %616 = vmatpush.bf16.msra.mxu0 %v1362_v17  ;;  %629 = vmatpush.bf16.msra.mxu1 %v1426_v39  ;;  %v1835_v17 = vld [vmem:[#allocation4 + $0x1ac] sm:$0xf] }
  0x52   :  { %642 = vmatpush.bf16.msra.mxu2 %v1366_v18  ;;  %v1813_v39 = vld [vmem:[#allocation4 + $0x4c] sm:$0xf] }
  0x53   :  { %655 = vmatpush.bf16.msra.mxu3 %v1430_v40  ;;  %v1499_v40 = vld [vmem:[#allocation4 + $0x58] sm:$0xf0] }
  0x91   :  { %v106_v60 = vpop.f32.mrf.mxu0  ;;  %v119_v1 = vpop.f32.mrf.mxu1 }
  0x92   :  { %v107_v0 = vadd.f32 %v106_v60, %v65_v51  ;;  %v120_v6 = vadd.f32 %v119_v1, %v66_v55  ;;  %v1821_v51 = vld [vmem:[#allocation4 + $0xcc] sm:$0xf]  ;;  %v1601_v55 = vld [vmem:[#allocation4 + $0x1e8] sm:$0xf]  ;;  %v1606_v60 = vor.u32 %v1839_v57, %v1603_v59  ;;  %v1523_v1 = vld [vmem:[#allocation4 + $0xb8] sm:$0xf0] }
  0x93   :  { %v1534_v54 = vor.u32 %v1821_v51, %v1531_v53  ;;  %v1602_v58 = vor.u32 %v1840_v56, %v1601_v55  ;;  %v1526_v2 = vor.u32 %v1819_v63, %v1523_v1  ;;  %v1561_v53 = vld [vmem:[#allocation4 + $0x148] sm:$0xf]  ;;  %v1829_v56 = vld [vmem:[#allocation4 + $0x14c] sm:$0xf]  ;;  %v1563_v57 = vld [vmem:[#allocation4 + $0x158] sm:$0xf0] }
  0x94   :  { %v149_v10 = vmax.f32 %v107_v0, 0.0  ;;  %v150_v13 = vmax.f32 %v120_v6, 0.0  ;;  %v1522_v0 = vor.u32 %v1820_v62, %v1521_v61  ;;  %v1837_v6 = vld [vmem:[#allocation4 + $0x1cc] sm:$0xf]  ;;  %v1566_v59 = vor.u32 %v1829_v56, %v1563_v57  ;;  %v1828_v61 = vld [vmem:[#allocation4 + $0x134] sm:$0xf0] }
  0x95   :  { %v1598_v8 = vor.u32 %v1837_v6, %v1595_v7  ;;  %v1827_v62 = vld [vmem:[#allocation4 + $0x12c] sm:$0xf]  ;;  %v220_v63 = vld [vmem:[#allocation6 + $0x1] ss:$8 sm:$0x3] }
  0x96   :  { %v217_v16 = vpack.c.bf16 %v149_v10, %v149_v10  ;;  %v218_v19 = vpack.c.bf16 %v150_v13, %v150_v13  ;;  %v1818_v10 = vld [vmem:[#allocation4 + $0x94] sm:$0xf0]  ;;  %v1515_v13 = vld [vmem:[#allocation4 + $0x98] sm:$0xf0]  ;;  %v222_v3 = vperm.slane %v220_v63, 0  ;;  %v223_v7 = vperm.slane %v220_v63, 1 }
  0x97   :  { %v1514_v12 = vor.u32 %v1818_v10, %v1513_v9  ;;  %v1518_v14 = vor.u32 %v1817_v11, %v1515_v13  ;;  %v1555_v1 = vld [vmem:[#allocation4 + $0x138] sm:$0xf0]  ;;  %v1858_v10 = vld [vmem:[#allocation4 + $0x314] sm:$0xf0]  ;;  %v1857_v11 = vld [vmem:[#allocation4 + $0x30c] sm:$0xf] }
  0x98   :  { %394 = vmatmul.bf16.vlgmr.msrb.gmra.mxu0 %v217_v16  ;;  %420 = vmatmul.bf16.vlgmr.msrb.gmra.mxu2 %v217_v16  ;;  %v1836_v16 = vld [vmem:[#allocation4 + $0x1b4] sm:$0xf0]  ;;  %v1871_v56 = vld [vmem:[#allocation4 + $0x3ec] sm:$0xf]  ;;  %v1731_v57 = vld [vmem:[#allocation4 + $0x3f8] sm:$0xf0] }
  0x99   :  { %407 = vmatmul.bf16.vlgmr.msrb.gmra.mxu1 %v218_v19  ;;  %433 = vmatmul.bf16.vlgmr.msrb.gmra.mxu3 %v218_v19  ;;  %v108_v29 = vpop.f32.mrf.mxu0  ;;  %v121_v33 = vpop.f32.mrf.mxu1  ;;  %v1586_v18 = vor.u32 %v1836_v16, %v1585_v15  ;;  %v1587_v19 = vld [vmem:[#allocation4 + $0x1b8] sm:$0xf0] }
  0x9a   :  { %v1998_v35 = vpop.f32.mrf.mxu2  ;;  %v2000_v36 = vpop.f32.mrf.mxu3  ;;  %908 = vmatpush.bf16.msrb.mxu0 %v1546_v20  ;;  %934 = vmatpush.bf16.msrb.mxu2 %v1550_v21  ;;  %v1590_v20 = vor.u32 %v1835_v17, %v1587_v19  ;;  %v1505_v21 = vld [vmem:[#allocation4 + $0x68] sm:$0xf]  ;;  %v1833_v29 = vld [vmem:[#allocation4 + $0x18c] sm:$0xf]  ;;  %v1814_v33 = vld [vmem:[#allocation4 + $0x54] sm:$0xf0] }
  0x9b   :  { %921 = vmatpush.bf16.msrb.mxu1 %v1610_v46  ;;  %947 = vmatpush.bf16.msrb.mxu3 %v1614_v48  ;;  %v1506_v24 = vor.u32 %v1816_v22, %v1505_v21  ;;  %v1489_v48 = vld [vmem:[#allocation4 + $0x28] sm:$0xf]  ;;  %v133_v27 = vadd.f32 %v1998_v35, %v67_v23  ;;  %v1667_v35 = vld [vmem:[#allocation4 + $0x2f8] sm:$0xf0] }
  0x9c   :  { %v1490_v51 = vor.u32 %v1812_v49, %v1489_v48  ;;  %v1854_v48 = vld [vmem:[#allocation4 + $0x2d4] sm:$0xf0]  ;;  %v1853_v49 = vld [vmem:[#allocation4 + $0x2cc] sm:$0xf]  ;;  %v1651_v63 = vld [vmem:[#allocation4 + $0x2b8] sm:$0xf0] }
  0x9d   :  { %v1635_v23 = vld [vmem:[#allocation4 + $0x278] sm:$0xf0] }
  0x9e   :  { %909 = vmatpush.bf16.msrb.mxu0 %v1538_v37  ;;  %935 = vmatpush.bf16.msrb.mxu2 %v1542_v38  ;;  %v1582_v37 = vor.u32 %v1833_v29, %v1579_v31  ;;  %v1498_v38 = vor.u32 %v1814_v33, %v1497_v32  ;;  %v68_v29 = vperm.slane %v1994_v34, 3  ;;  %v1873_v34 = vld [vmem:[#allocation4 + $0x40c] sm:$0xf] }
  0x9f   :  { %922 = vmatpush.bf16.msrb.mxu1 %v1602_v58  ;;  %948 = vmatpush.bf16.msrb.mxu3 %v1606_v60  ;;  %v1553_v60 = vld [vmem:[#allocation4 + $0x128] sm:$0xf] }
  0xa0   :  { %v146_v31 = vadd.f32 %v2000_v36, %v68_v29  ;;  %v1707_v29 = vld [vmem:[#allocation4 + $0x398] sm:$0xf0] }
  0xa2   :  { %v134_v41 = vpop.f32.mrf.mxu2  ;;  %v147_v42 = vpop.f32.mrf.mxu3  ;;  %910 = vmatpush.bf16.msrb.mxu0 %v1530_v52  ;;  %936 = vmatpush.bf16.msrb.mxu2 %v1534_v54  ;;  %v1491_v52 = vld [vmem:[#allocation4 + $0x38] sm:$0xf0]  ;;  %v1830_v54 = vld [vmem:[#allocation4 + $0x154] sm:$0xf0]  ;;  %v152_v33 = vmax.f32 %v146_v31, 0.0 }
  0xa3   :  { %923 = vmatpush.bf16.msrb.mxu1 %v1594_v5  ;;  %949 = vmatpush.bf16.msrb.mxu3 %v1598_v8  ;;  %v1569_v41 = vld [vmem:[#allocation4 + $0x168] sm:$0xf]  ;;  %v1502_v42 = vor.u32 %v1813_v39, %v1499_v40  ;;  %v1494_v55 = vor.u32 %v1811_v50, %v1491_v52  ;;  %v1562_v58 = vor.u32 %v1830_v54, %v1561_v53  ;;  %v1856_v39 = vld [vmem:[#allocation4 + $0x2f4] sm:$0xf0]  ;;  %v1855_v40 = vld [vmem:[#allocation4 + $0x2ec] sm:$0xf] }
  0xa4   :  { %v1570_v46 = vor.u32 %v1832_v43, %v1569_v41  ;;  %v1673_v8 = vld [vmem:[#allocation4 + $0x308] sm:$0xf]  ;;  %v1874_v43 = vld [vmem:[#allocation4 + $0x414] sm:$0xf0]  ;;  %v1670_v44 = vor.u32 %v1855_v40, %v1667_v35 }
  0xa5   :  { %v1674_v15 = vor.u32 %v1858_v10, %v1673_v8  ;;  %v1729_v53 = vld [vmem:[#allocation4 + $0x3e8] sm:$0xf]  ;;  %v1872_v54 = vld [vmem:[#allocation4 + $0x3f4] sm:$0xf0] }
  0xa6   :  { %911 = vmatpush.bf16.msrb.mxu0 %v1522_v0  ;;  %937 = vmatpush.bf16.msrb.mxu2 %v1526_v2  ;;  %v1554_v0 = vor.u32 %v1828_v61, %v1553_v60  ;;  %v1558_v2 = vor.u32 %v1827_v62, %v1555_v1  ;;  %v1852_v60 = vld [vmem:[#allocation4 + $0x2b4] sm:$0xf0]  ;;  %v1851_v61 = vld [vmem:[#allocation4 + $0x2ac] sm:$0xf]  ;;  %v1721_v1 = vld [vmem:[#allocation4 + $0x3c8] sm:$0xf] }
  0xa7   :  { %924 = vmatpush.bf16.msrb.mxu1 %v1586_v18  ;;  %950 = vmatpush.bf16.msrb.mxu3 %v1590_v20  ;;  %v1850_v8 = vld [vmem:[#allocation4 + $0x294] sm:$0xf0]  ;;  %v1625_v31 = vld [vmem:[#allocation4 + $0x248] sm:$0xf] }
  0xa8   :  { %v1697_v40 = vld [vmem:[#allocation4 + $0x368] sm:$0xf] }
  0xaa   :  { %912 = vmatpush.bf16.msrb.mxu0 %v1514_v12  ;;  %938 = vmatpush.bf16.msrb.mxu2 %v1518_v14  ;;  %v1675_v12 = vld [vmem:[#allocation4 + $0x318] sm:$0xf0] }
  0xab   :  { %925 = vmatpush.bf16.msrb.mxu1 %v1578_v30  ;;  %951 = vmatpush.bf16.msrb.mxu3 %v1582_v37  ;;  %v1678_v16 = vor.u32 %v1857_v11, %v1675_v12  ;;  %v151_v30 = vmax.f32 %v133_v27, 0.0  ;;  %v740_v37 = vpack.c.bf16 %v152_v33, %v152_v33  ;;  %v1643_v11 = vld [vmem:[#allocation4 + $0x298] sm:$0xf0]  ;;  %v1865_v27 = vld [vmem:[#allocation4 + $0x38c] sm:$0xf] }
  0xac   :  { %v1845_v33 = vld [vmem:[#allocation4 + $0x24c] sm:$0xf] }
  0xad   :  { %v739_v32 = vpack.c.bf16 %v151_v30, %v151_v30  ;;  %v1710_v30 = vor.u32 %v1865_v27, %v1707_v29 }
  0xae   :  { %913 = vmatpush.bf16.msrb.mxu0 %v1506_v24  ;;  %939 = vmatpush.bf16.msrb.mxu2 %v1510_v26 }
  0xaf   :  { %926 = vmatpush.bf16.msrb.mxu1 %v1570_v46  ;;  %952 = vmatpush.bf16.msrb.mxu3 %v1574_v47  ;;  %v1739_v46 = vld [vmem:[#allocation4 + $0x418] sm:$0xf0]  ;;  %v1657_v47 = vld [vmem:[#allocation4 + $0x2c8] sm:$0xf] }
  0xb0   :  { %v1742_v36 = vor.u32 %v1873_v34, %v1739_v46  ;;  %v1658_v50 = vor.u32 %v1854_v48, %v1657_v47  ;;  %v1844_v34 = vld [vmem:[#allocation4 + $0x234] sm:$0xf0]  ;;  %v1843_v46 = vld [vmem:[#allocation4 + $0x22c] sm:$0xf]  ;;  %v1619_v47 = vld [vmem:[#allocation4 + $0x238] sm:$0xf0] }
  0xb1   :  { %v1622_v48 = vor.u32 %v1843_v46, %v1619_v47 }
  0xb2   :  { %914 = vmatpush.bf16.msrb.mxu0 %v1498_v38  ;;  %940 = vmatpush.bf16.msrb.mxu2 %v1502_v42  ;;  %v1665_v38 = vld [vmem:[#allocation4 + $0x2e8] sm:$0xf] }
  0xb3   :  { %927 = vmatpush.bf16.msrb.mxu1 %v1562_v58  ;;  %953 = vmatpush.bf16.msrb.mxu3 %v1566_v59  ;;  %v1666_v41 = vor.u32 %v1856_v39, %v1665_v38  ;;  %v1737_v42 = vld [vmem:[#allocation4 + $0x408] sm:$0xf]  ;;  %v1734_v58 = vor.u32 %v1871_v56, %v1731_v57  ;;  %v1627_v38 = vld [vmem:[#allocation4 + $0x258] sm:$0xf0]  ;;  %v1860_v56 = vld [vmem:[#allocation4 + $0x334] sm:$0xf0] }
  0xb4   :  { %v1738_v45 = vor.u32 %v1874_v43, %v1737_v42  ;;  %v1649_v59 = vld [vmem:[#allocation4 + $0x2a8] sm:$0xf]  ;;  %v1630_v39 = vor.u32 %v1845_v33, %v1627_v38  ;;  %v1863_v42 = vld [vmem:[#allocation4 + $0x36c] sm:$0xf]  ;;  %v1699_v43 = vld [vmem:[#allocation4 + $0x378] sm:$0xf0] }
  0xb5   :  { %v1650_v62 = vor.u32 %v1852_v60, %v1649_v59  ;;  %v1859_v57 = vld [vmem:[#allocation4 + $0x32c] sm:$0xf]  ;;  %v1683_v59 = vld [vmem:[#allocation4 + $0x338] sm:$0xf0] }
  0xb6   :  { %915 = vmatpush.bf16.msrb.mxu0 %v1490_v51  ;;  %941 = vmatpush.bf16.msrb.mxu2 %v1494_v55  ;;  %v1659_v51 = vld [vmem:[#allocation4 + $0x2d8] sm:$0xf0]  ;;  %v1730_v55 = vor.u32 %v1872_v54, %v1729_v53  ;;  %v443_v60 = vld [vmem:[#allocation6 + $0x2] ss:$8 sm:$0x3] }
  0xb7   :  { %928 = vmatpush.bf16.msrb.mxu1 %v1554_v0  ;;  %954 = vmatpush.bf16.msrb.mxu3 %v1558_v2  ;;  %v1662_v52 = vor.u32 %v1853_v49, %v1659_v51  ;;  %v1654_v0 = vor.u32 %v1851_v61, %v1651_v63  ;;  %v1870_v2 = vld [vmem:[#allocation4 + $0x3d4] sm:$0xf0]  ;;  %v1689_v49 = vld [vmem:[#allocation4 + $0x348] sm:$0xf]  ;;  %v1861_v51 = vld [vmem:[#allocation4 + $0x34c] sm:$0xf] }
  0xb8   :  { %v1691_v53 = vld [vmem:[#allocation4 + $0x358] sm:$0xf0]  ;;  %v445_v63 = vperm.slane %v443_v60, 0 }
  0xb9   :  { %v1694_v54 = vor.u32 %v1861_v51, %v1691_v53  ;;  %v1186_v51 = vld [vmem:[#allocation6 + $0x13] ss:$8 sm:$0x3] }
 0x115   :  { %v395_v4 = vpop.f32.mrf.mxu0 }
 0x116   :  { %v396_v5 = vadd.f32 %v395_v4, %v222_v3  ;;  %v408_v6 = vpop.f32.mrf.mxu1  ;;  %v1869_v3 = vld [vmem:[#allocation4 + $0x3cc] sm:$0xf]  ;;  %v1722_v4 = vor.u32 %v1870_v2, %v1721_v1 }
 0x118   :  { %v409_v9 = vadd.f32 %v408_v6, %v396_v5  ;;  %v1723_v5 = vld [vmem:[#allocation4 + $0x3d8] sm:$0xf0] }
 0x119   :  { %v1726_v6 = vor.u32 %v1869_v3, %v1723_v5  ;;  %v446_v3 = vperm.slane %v443_v60, 1 }
 0x11a   :  { %v438_v13 = vmax.f32 %v409_v9, 0.0  ;;  %v1849_v9 = vld [vmem:[#allocation4 + $0x28c] sm:$0xf] }
 0x11b   :  { %v421_v14 = vpop.f32.mrf.mxu2  ;;  %v1646_v12 = vor.u32 %v1849_v9, %v1643_v11 }
 0x11c   :  { %v440_v17 = vpack.c.bf16 %v438_v13, %v438_v13  ;;  %v422_v18 = vadd.f32 %v421_v14, %v223_v7  ;;  %v434_v19 = vpop.f32.mrf.mxu3  ;;  %v1641_v7 = vld [vmem:[#allocation4 + $0x288] sm:$0xf]  ;;  %v1868_v14 = vld [vmem:[#allocation4 + $0x3b4] sm:$0xf0] }
 0x11d   :  { %v397_v20 = vpop.f32.mrf.mxu0  ;;  %v1642_v10 = vor.u32 %v1850_v8, %v1641_v7  ;;  %v1713_v13 = vld [vmem:[#allocation4 + $0x3a8] sm:$0xf] }
 0x11e   :  { %v435_v21 = vadd.f32 %v434_v19, %v422_v18  ;;  %v410_v22 = vpop.f32.mrf.mxu1  ;;  %617 = vmatmul.bf16.vlgmr.msra.gmra.mxu0 %v440_v17  ;;  %643 = vmatmul.bf16.vlgmr.msra.gmra.mxu2 %v440_v17  ;;  %v1715_v17 = vld [vmem:[#allocation4 + $0x3b8] sm:$0xf0]  ;;  %v1633_v19 = vld [vmem:[#allocation4 + $0x268] sm:$0xf]  ;;  %v1848_v20 = vld [vmem:[#allocation4 + $0x274] sm:$0xf0] }
 0x11f   :  { %1131 = vmatpush.bf16.msra.mxu0 %v1674_v15  ;;  %1157 = vmatpush.bf16.msra.mxu2 %v1678_v16  ;;  %v1867_v15 = vld [vmem:[#allocation4 + $0x3ac] sm:$0xf]  ;;  %v1714_v16 = vor.u32 %v1868_v14, %v1713_v13 }
 0x120   :  { %v439_v24 = vmax.f32 %v435_v21, 0.0  ;;  %v1718_v18 = vor.u32 %v1867_v15, %v1715_v17  ;;  %v1634_v21 = vor.u32 %v1848_v20, %v1633_v19  ;;  %v1847_v22 = vld [vmem:[#allocation4 + $0x26c] sm:$0xf]  ;;  %v742_v15 = vld [vmem:[#allocation6 + $0x11] ss:$8 sm:$0x3] }
 0x121   :  { %v745_v27 = vperm.slane %v742_v15, 1 }
 0x122   :  { %v441_v25 = vpack.c.bf16 %v439_v24, %v439_v24  ;;  %v1638_v24 = vor.u32 %v1847_v22, %v1635_v23 }
 0x123   :  { %v423_v26 = vpop.f32.mrf.mxu2  ;;  %1132 = vmatpush.bf16.msra.mxu0 %v1666_v41  ;;  %1158 = vmatpush.bf16.msra.mxu2 %v1670_v44  ;;  %v1864_v41 = vld [vmem:[#allocation4 + $0x374] sm:$0xf0]  ;;  %v1702_v44 = vor.u32 %v1863_v42, %v1699_v43 }
 0x124   :  { %v436_v28 = vpop.f32.mrf.mxu3  ;;  %630 = vmatmul.bf16.vlgmr.msra.gmra.mxu1 %v441_v25  ;;  %656 = vmatmul.bf16.vlgmr.msra.gmra.mxu3 %v441_v25  ;;  %v1705_v25 = vld [vmem:[#allocation4 + $0x388] sm:$0xf]  ;;  %v1866_v26 = vld [vmem:[#allocation4 + $0x394] sm:$0xf0]  ;;  %v1698_v35 = vor.u32 %v1864_v41, %v1697_v40 }
 0x125   :  { %1144 = vmatpush.bf16.msra.mxu1 %v1738_v45  ;;  %1170 = vmatpush.bf16.msra.mxu3 %v1742_v36  ;;  %v1706_v28 = vor.u32 %v1866_v26, %v1705_v25  ;;  %v1617_v45 = vld [vmem:[#allocation4 + $0x228] sm:$0xf] }
 0x126   :  { %v1618_v36 = vor.u32 %v1844_v34, %v1617_v45 }
 0x127   :  { %1133 = vmatpush.bf16.msra.mxu0 %v1658_v50  ;;  %1159 = vmatpush.bf16.msra.mxu2 %v1662_v52  ;;  %v1862_v50 = vld [vmem:[#allocation4 + $0x354] sm:$0xf0] }
 0x128   :  { %v1690_v52 = vor.u32 %v1862_v50, %v1689_v49 }
 0x129   :  { %1145 = vmatpush.bf16.msra.mxu1 %v1730_v55  ;;  %1171 = vmatpush.bf16.msra.mxu3 %v1734_v58  ;;  %v1681_v55 = vld [vmem:[#allocation4 + $0x328] sm:$0xf] }
 0x12a   :  { %v1682_v58 = vor.u32 %v1860_v56, %v1681_v55  ;;  %v1188_v55 = vperm.slane %v1186_v51, 0 }
 0x12b   :  { %1134 = vmatpush.bf16.msra.mxu0 %v1650_v62  ;;  %1160 = vmatpush.bf16.msra.mxu2 %v1654_v0  ;;  %v1686_v62 = vor.u32 %v1859_v57, %v1683_v59  ;;  %v1189_v57 = vperm.slane %v1186_v51, 1 }
 0x12d   :  { %1146 = vmatpush.bf16.msra.mxu1 %v1722_v4  ;;  %1172 = vmatpush.bf16.msra.mxu3 %v1726_v6  ;;  %v664_v6 = vld [vmem:[#allocation6 + $0x3] ss:$8 sm:$0x3] }
 0x12e   :  { %916 = vmatmul.bf16.vlgmr.msrb.gmra.mxu0 %v739_v32  ;;  %942 = vmatmul.bf16.vlgmr.msrb.gmra.mxu2 %v739_v32  ;;  %v1846_v32 = vld [vmem:[#allocation4 + $0x254] sm:$0xf0]  ;;  %v666_v11 = vperm.slane %v664_v6, 0 }
 0x12f   :  { %1135 = vmatpush.bf16.msra.mxu0 %v1642_v10  ;;  %1161 = vmatpush.bf16.msra.mxu2 %v1646_v12  ;;  %v667_v12 = vperm.slane %v664_v6, 1 }
 0x131   :  { %1147 = vmatpush.bf16.msra.mxu1 %v1714_v16  ;;  %1173 = vmatpush.bf16.msra.mxu3 %v1718_v18  ;;  %v744_v18 = vperm.slane %v742_v15, 0 }
 0x133   :  { %1136 = vmatpush.bf16.msra.mxu0 %v1634_v21  ;;  %1162 = vmatpush.bf16.msra.mxu2 %v1638_v24 }
 0x134   :  { %929 = vmatmul.bf16.vlgmr.msrb.gmra.mxu1 %v740_v37  ;;  %955 = vmatmul.bf16.vlgmr.msrb.gmra.mxu3 %v740_v37  ;;  %v1626_v37 = vor.u32 %v1846_v32, %v1625_v31 }
 0x135   :  { %1148 = vmatpush.bf16.msra.mxu1 %v1706_v28  ;;  %1174 = vmatpush.bf16.msra.mxu3 %v1710_v30 }
 0x137   :  { %1137 = vmatpush.bf16.msra.mxu0 %v1626_v37  ;;  %1163 = vmatpush.bf16.msra.mxu2 %v1630_v39 }
 0x139   :  { %1149 = vmatpush.bf16.msra.mxu1 %v1698_v35  ;;  %1175 = vmatpush.bf16.msra.mxu3 %v1702_v44  ;;  %v1197_v35 = vld [vmem:[#allocation6 + $0x4] ss:$0 sm:$0xff]  ;;  %v965_v44 = vld [vmem:[#allocation6 + $0x12] ss:$8 sm:$0x3] }
 0x13a   :  { %v967_v34 = vperm.slane %v965_v44, 0 }
 0x13b   :  { %1138 = vmatpush.bf16.msra.mxu0 %v1618_v36  ;;  %1164 = vmatpush.bf16.msra.mxu2 %v1622_v48  ;;  %v968_v48 = vperm.slane %v965_v44, 1 }
 0x13d   :  { %1150 = vmatpush.bf16.msra.mxu1 %v1690_v52  ;;  %1176 = vmatpush.bf16.msra.mxu3 %v1694_v54 }
 0x141   :  { %1151 = vmatpush.bf16.msra.mxu1 %v1682_v58  ;;  %1177 = vmatpush.bf16.msra.mxu3 %v1686_v62 }
 0x19b   :  { %v618_v61 = vpop.f32.mrf.mxu0 }
 0x19c   :  { %v619_v2 = vadd.f32 %v618_v61, %v445_v63 }
 0x1a1   :  { %v631_v0 = vpop.f32.mrf.mxu1  ;;  %v644_v1 = vpop.f32.mrf.mxu2 }
 0x1a2   :  { %v632_v5 = vadd.f32 %v631_v0, %v619_v2  ;;  %v645_v7 = vadd.f32 %v644_v1, %v446_v3 }
 0x1a3   :  { %v620_v4 = vpop.f32.mrf.mxu0 }
 0x1a4   :  { %v661_v9 = vmax.f32 %v632_v5, 0.0 }
 0x1a6   :  { %v670_v19 = vmul.f32 %v666_v11, %v661_v9 }
 0x1a7   :  { %v657_v8 = vpop.f32.mrf.mxu3 }
 0x1a8   :  { %v658_v10 = vadd.f32 %v657_v8, %v645_v7 }
 0x1a9   :  { %v633_v13 = vpop.f32.mrf.mxu1  ;;  %v646_v14 = vpop.f32.mrf.mxu2 }
 0x1aa   :  { %v662_v16 = vmax.f32 %v658_v10, 0.0 }
 0x1ab   :  { %v917_v17 = vpop.f32.mrf.mxu0 }
 0x1ac   :  { %v671_v20 = vmul.f32 %v667_v12, %v662_v16  ;;  %v918_v23 = vadd.f32 %v917_v17, %v744_v18 }
 0x1ae   :  { %v672_v21 = vadd.f32 %v671_v20, %v670_v19 }
 0x1af   :  { %v659_v22 = vpop.f32.mrf.mxu3 }
 0x1b0   :  { %673 = vadd.xlane.f32.xlu0 %v672_v21 }
 0x1b1   :  { %v930_v24 = vpop.f32.mrf.mxu1  ;;  %v943_v25 = vpop.f32.mrf.mxu2 }
 0x1b2   :  { %v931_v26 = vadd.f32 %v930_v24, %v918_v23  ;;  %v944_v31 = vadd.f32 %v943_v25, %v745_v27 }
 0x1b3   :  { %v919_v28 = vpop.f32.mrf.mxu0 }
 0x1b4   :  { %v960_v29 = vmax.f32 %v931_v26, 0.0 }
 0x1b6   :  { %v962_v30 = vpack.c.bf16 %v960_v29, %v960_v29 }
 0x1b7   :  { %v956_v32 = vpop.f32.mrf.mxu3 }
 0x1b8   :  { %v957_v33 = vadd.f32 %v956_v32, %v944_v31  ;;  %1139 = vmatmul.bf16.vlgmr.msra.gmra.mxu0 %v962_v30  ;;  %1165 = vmatmul.bf16.vlgmr.msra.gmra.mxu2 %v962_v30 }
 0x1b9   :  { %v932_v37 = vpop.f32.mrf.mxu1  ;;  %v945_v38 = vpop.f32.mrf.mxu2 }
 0x1ba   :  { %v961_v39 = vmax.f32 %v957_v33, 0.0 }
 0x1bc   :  { %v963_v40 = vpack.c.bf16 %v961_v39, %v961_v39 }
 0x1be   :  { %1152 = vmatmul.bf16.vlgmr.msra.gmra.mxu1 %v963_v40  ;;  %1178 = vmatmul.bf16.vlgmr.msra.gmra.mxu3 %v963_v40 }
 0x1bf   :  { %v958_v41 = vpop.f32.mrf.mxu3 }
 0x223   :  { %v674_v42 = vpop.xlane.xlu0 %673 }
 0x224   :  { %v1198_v43 = vadd.f32 %v1197_v35, %v674_v42 }
 0x226   :  { %1200 = vst.msk [vmem:[%s2015_s3] sm:$0xff] %vm1199_vm1, %v1198_v43 }
 0x235   :  { %v1140_v45 = vpop.f32.mrf.mxu0 }
 0x236   :  { %v1141_v47 = vadd.f32 %v1140_v45, %v967_v34 }
 0x23b   :  { %v1153_v46 = vpop.f32.mrf.mxu1  ;;  %v1166_v36 = vpop.f32.mrf.mxu2 }
 0x23c   :  { %v1154_v50 = vadd.f32 %v1153_v46, %v1141_v47  ;;  %v1167_v52 = vadd.f32 %v1166_v36, %v968_v48 }
 0x23d   :  { %v1142_v49 = vpop.f32.mrf.mxu0 }
 0x23e   :  { %v1183_v54 = vmax.f32 %v1154_v50, 0.0 }
 0x240   :  { %v1192_v61 = vmul.f32 %v1188_v55, %v1183_v54 }
 0x241   :  { %v1179_v53 = vpop.f32.mrf.mxu3 }
 0x242   :  { %v1180_v56 = vadd.f32 %v1179_v53, %v1167_v52 }
 0x243   :  { %v1155_v58 = vpop.f32.mrf.mxu1  ;;  %v1168_v59 = vpop.f32.mrf.mxu2 }
 0x244   :  { %v1184_v60 = vmax.f32 %v1180_v56, 0.0 }
 0x246   :  { %v1193_v62 = vmul.f32 %v1189_v57, %v1184_v60 }
 0x248   :  { %v1194_v63 = vadd.f32 %v1193_v62, %v1192_v61 }
 0x249   :  { %v1181_v0 = vpop.f32.mrf.mxu3 }
 0x24a   :  { %1195 = vadd.xlane.f32.xlu0 %v1194_v63 }
 0x2bd   :  { %v1196_v1 = vpop.xlane.xlu0 %1195 }
 0x2be   :  { %v1202_v2 = vadd.f32 %v1197_v35, %v1196_v1 }
 0x2c0   :  { %1204 = vst.msk [vmem:[%s2015_s3] sm:$0xff] %vm1203_vm2, %v1202_v2 }
 0x2c1   :  { %1209 = vsyncpa [#allocation3], 1 }
 0x2c2   :  { %1210 = vsyncpa [#allocation5], 1 }

</bundles_post_ra>
